<compile_context>
chip_gen: v5e
topology: v5e:2x2
jax: 0.10.0
libtpu: 0.0.40
codegen_flags: <defaults>
</compile_context>

<pallas_src>
import functools

import jax
import jax.numpy as jnp
from jax.experimental import pallas as pl
from jax.experimental.pallas import tpu as pltpu

LANE = 128


def _round_up(x, m):
    return (x + m - 1) // m * m


def _largest_tile(n_pad, preferred):
    """Largest multiple of LANE that divides n_pad and is <= preferred."""
    best = LANE
    t = LANE
    upper = min(n_pad, max(preferred, LANE))
    while t <= upper:
        if n_pad % t == 0:
            best = t
        t += LANE
    return best


def _vmem_capacity_bytes():
    try:
        return int(pltpu.get_tpu_info().vmem_capacity_bytes)
    except Exception:
        return 64 << 20  # conservative fallback: v7x per-TC VMEM


def _compiler_params(semantics, working_set_bytes):
    """Only override vmem_limit_bytes when the working set actually needs it,
    with headroom, and never request (close to) the whole physical VMEM."""
    kwargs = dict(dimension_semantics=semantics)
    if working_set_bytes > (12 << 20):
        cap = _vmem_capacity_bytes()
        kwargs["vmem_limit_bytes"] = int(
            min(working_set_bytes + (8 << 20), cap - (8 << 20))
        )
    return pltpu.CompilerParams(**kwargs)


# ----------------------------- Pallas kernels -------------------------------

def xw_kernel(x_ref, w_ref, o_ref):
    """o = X @ W  (bf16 operands, f32 accumulate on the MXU, bf16 out)."""
    o_ref[...] = jnp.dot(
        x_ref[...], w_ref[...], preferred_element_type=jnp.float32
    ).astype(o_ref.dtype)


def xw_matmul(x, w, *, tm):
    """Row-tiled X @ W.  x: [n_pad, f_in_pad] bf16, w: [f_in_pad, f_out_pad] bf16."""
    n_pad, f_in = x.shape
    f_out = w.shape[1]
    ws = 2 * (tm * f_in + f_in * f_out + tm * f_out) * 2
    return pl.pallas_call(
        xw_kernel,
        out_shape=jax.ShapeDtypeStruct((n_pad, f_out), jnp.bfloat16),
        grid_spec=pltpu.PrefetchScalarGridSpec(
            num_scalar_prefetch=0,
            grid=(n_pad // tm,),
            in_specs=[
                pl.BlockSpec((tm, f_in), lambda i: (i, 0)),
                pl.BlockSpec((f_in, f_out), lambda i: (0, 0)),
            ],
            out_specs=pl.BlockSpec((tm, f_out), lambda i: (i, 0)),
        ),
        compiler_params=_compiler_params(("parallel",), ws),
        cost_estimate=pl.CostEstimate(
            flops=2 * n_pad * f_in * f_out,
            transcendentals=0,
            bytes_accessed=(n_pad * f_in + f_in * f_out + n_pad * f_out) * 2,
        ),
    )(x, w)


def agg_resident_kernel(a_ref, xw_ref, b_ref, o_ref, *, apply_relu):
    """out = act(A_hat_rows @ XW + b) with XW fully resident in VMEM."""
    out = jnp.dot(
        a_ref[...], xw_ref[...], preferred_element_type=jnp.float32
    ) + b_ref[...]
    if apply_relu:
        out = jnp.maximum(out, 0.0)
    o_ref[...] = out.astype(o_ref.dtype)


def agg_tiled_kernel(a_ref, xw_ref, b_ref, o_ref, acc_ref, *, apply_relu):
    """Tiled out = act(A_hat @ XW + b) with f32 VMEM accumulator over k."""
    k = pl.program_id(1)

    @pl.when(k == 0)
    def _():
        acc_ref[...] = jnp.zeros_like(acc_ref)

    acc_ref[...] += jnp.dot(
        a_ref[...], xw_ref[...], preferred_element_type=jnp.float32
    )

    @pl.when(k == pl.num_programs(1) - 1)
    def _():
        out = acc_ref[...] + b_ref[...]
        if apply_relu:
            out = jnp.maximum(out, 0.0)
        o_ref[...] = out.astype(o_ref.dtype)


def gcn_aggregate(a_norm, xw, b, *, out_dtype, apply_relu,
                  preferred_tm=1024, preferred_tk=512, force_tiled=False):
    """A_hat @ XW + b.  Resident-XW fast path when it fits VMEM, else tiled
    reduction (asymmetric tm>tk, Buffered(3) on the A stream)."""
    n_pad = a_norm.shape[0]
    f_out = xw.shape[1]
    out_isz = jnp.dtype(out_dtype).itemsize
    budget = _vmem_capacity_bytes() - (12 << 20)

    def resident_ws(tm):
        return (2 * tm * n_pad * 2          # A row tiles (double-buffered bf16)
                + 2 * n_pad * f_out * 2     # resident XW (budget 2 buffers)
                + 2 * tm * f_out * 4        # output tiles
                + 2 * f_out * 4)            # bias

    def tiled_ws(tm, tk):
        return (3 * tm * tk * 2             # A tiles, Buffered(3)
                + 2 * tk * f_out * 2        # XW tiles
                + 2 * tm * f_out * 4        # output tiles
                + tm * f_out * 4            # f32 accumulator scratch
                + 2 * f_out * 4)

    tm = _largest_tile(n_pad, preferred_tm)
    use_resident = not force_tiled
    if use_resident:
        while tm > LANE and resident_ws(tm) > budget:
            tm = _largest_tile(n_pad, tm - LANE)
        use_resident = resident_ws(tm) <= budget

    if use_resident:
        kernel = functools.partial(agg_resident_kernel, apply_relu=apply_relu)
        return pl.pallas_call(
            kernel,
            out_shape=jax.ShapeDtypeStruct((n_pad, f_out), out_dtype),
            grid_spec=pltpu.PrefetchScalarGridSpec(
                num_scalar_prefetch=0,
                grid=(n_pad // tm,),
                in_specs=[
                    pl.BlockSpec((tm, n_pad), lambda i: (i, 0)),      # A_hat rows
                    pl.BlockSpec((n_pad, f_out), lambda i: (0, 0)),   # resident XW
                    pl.BlockSpec((1, f_out), lambda i: (0, 0)),       # bias
                ],
                out_specs=pl.BlockSpec((tm, f_out), lambda i: (i, 0)),
            ),
            compiler_params=_compiler_params(("parallel",), resident_ws(tm)),
            cost_estimate=pl.CostEstimate(
                flops=2 * n_pad * n_pad * f_out,
                transcendentals=0,
                bytes_accessed=(n_pad * n_pad + n_pad * f_out) * 2
                + n_pad * f_out * out_isz,
            ),
        )(a_norm, xw, b)

    # Tiled fallback for graphs where XW cannot stay resident in VMEM.
    tm = _largest_tile(n_pad, preferred_tm)
    tk = _largest_tile(n_pad, preferred_tk)
    while tm > LANE and tiled_ws(tm, tk) > budget:
        tm = _largest_tile(n_pad, tm - LANE)
    kernel = functools.partial(agg_tiled_kernel, apply_relu=apply_relu)
    return pl.pallas_call(
        kernel,
        out_shape=jax.ShapeDtypeStruct((n_pad, f_out), out_dtype),
        grid_spec=pltpu.PrefetchScalarGridSpec(
            num_scalar_prefetch=0,
            grid=(n_pad // tm, n_pad // tk),
            in_specs=[
                pl.BlockSpec((tm, tk), lambda i, k: (i, k),
                             pipeline_mode=pl.Buffered(3)),           # A_hat
                pl.BlockSpec((tk, f_out), lambda i, k: (k, 0)),       # XW
                pl.BlockSpec((1, f_out), lambda i, k: (0, 0)),        # bias
            ],
            out_specs=pl.BlockSpec((tm, f_out), lambda i, k: (i, 0)),
            scratch_shapes=[pltpu.VMEM((tm, f_out), jnp.float32)],
        ),
        compiler_params=_compiler_params(("parallel", "arbitrary"),
                                         tiled_ws(tm, tk)),
        cost_estimate=pl.CostEstimate(
            flops=2 * n_pad * n_pad * f_out,
            transcendentals=0,
            bytes_accessed=n_pad * n_pad * 2
            + (n_pad // tm) * n_pad * f_out * 2
            + n_pad * f_out * out_isz,
        ),
    )(a_norm, xw, b)


# ------------------------------ JAX glue ------------------------------------

def build_norm_adj(edge_index, edge_weights, num_nodes, n_pad):
    """Dense GCN-normalized adjacency A_hat = D^-1/2 (A + I) D^-1/2 with
    A[dst, src] = w, zero-padded to [n_pad, n_pad] and cast to bf16 ONCE."""
    src = edge_index[0]
    dst = edge_index[1]
    loop = jnp.arange(num_nodes, dtype=edge_index.dtype)
    src = jnp.concatenate([src, loop])
    dst = jnp.concatenate([dst, loop])
    w = jnp.concatenate(
        [edge_weights.astype(jnp.float32), jnp.ones((num_nodes,), jnp.float32)]
    )
    # degree at the target (dst) index, as in PyG gcn_norm
    deg = jnp.zeros((num_nodes,), jnp.float32).at[dst].add(w)
    dinv = jnp.where(deg > 0, jax.lax.rsqrt(deg), 0.0)
    norm = dinv[src] * w * dinv[dst]
    # aggregation: out[dst] += norm * x_lin[src]  ->  A[dst, src] = norm
    a = jnp.zeros((num_nodes, num_nodes), jnp.float32).at[dst, src].add(norm)
    a = a.astype(jnp.bfloat16)
    # TODO(synk): for very large N, build/cast A_hat in row-tile chunks (or via
    # a CSR-gather kernel) so the f32 N^2 intermediate never lands in HBM.
    return jnp.pad(a, ((0, n_pad - num_nodes), (0, n_pad - num_nodes)))


def init_params(key, in_size, out_size, h_sizes):
    """Glorot-uniform weights + zero bias for every GCNConv layer."""
    sizes = [in_size] + list(h_sizes) + [out_size]
    params = []
    for k in range(len(sizes) - 1):
        key, wk = jax.random.split(key)
        fan_in, fan_out = sizes[k], sizes[k + 1]
        limit = (6.0 / (fan_in + fan_out)) ** 0.5
        w = jax.random.uniform(wk, (fan_in, fan_out), jnp.float32, -limit, limit)
        b = jnp.zeros((1, fan_out), jnp.float32)
        params.append((w, b))
    return params


def _pad_params(params):
    """Zero-pad each (W, b) to 128-lane multiples; W cast to bf16 once."""
    padded = []
    for w, b in params:
        f_in, f_out = w.shape
        f_in_p = _round_up(f_in, LANE)
        f_out_p = _round_up(f_out, LANE)
        w_p = jnp.zeros((f_in_p, f_out_p), jnp.float32).at[:f_in, :f_out].set(w)
        b_p = jnp.zeros((1, f_out_p), jnp.float32).at[:, :f_out].set(
            b.reshape(1, -1))
        padded.append((w_p.astype(jnp.bfloat16), b_p))
    return padded


def basic_gcn_nc_forward(params, x, edge_index, edge_weights, n_activs,
                         dropout=0.5, training=False,
                         preferred_tm=1024, preferred_tk=512,
                         force_tiled=False):
    """Mirrors basic_gcn_nc.forward: zip(hidden, activs) truncates execution to
    n_activs layers; each executed layer = GCNConv -> dropout -> ReLU.
    Inference mode: F.dropout(training=False) is the identity."""
    num_nodes, in_size = x.shape

    # Tight node padding (128 lanes only) -> no quadratic padding waste on A.
    n_pad = _round_up(num_nodes, LANE)

    a_norm = build_norm_adj(edge_index, edge_weights, num_nodes, n_pad)

    in_pad = _round_up(in_size, LANE)
    h = jnp.zeros((n_pad, in_pad), jnp.bfloat16).at[:num_nodes, :in_size].set(
        x.astype(jnp.bfloat16))

    padded_params = _pad_params(params)
    n_layers = min(len(params), n_activs)
    tm_xw = _largest_tile(n_pad, preferred_tm)
    for i in range(n_layers):
        w_p, b_p = padded_params[i]
        xw = xw_matmul(h, w_p, tm=tm_xw)               # [n_pad, f_out_pad] bf16
        last = (i == n_layers - 1)
        h = gcn_aggregate(
            a_norm, xw, b_p,
            out_dtype=jnp.float32 if last else jnp.bfloat16,
            apply_relu=True,
            preferred_tm=preferred_tm, preferred_tk=preferred_tk,
            force_tiled=force_tiled)
        # dropout: identity in inference mode.
        # TODO(synk): training-mode dropout via pltpu.prng_* if needed.

    # NOTE: padded rows (index >= num_nodes) hold relu(bias); they never feed
    # real rows (A_hat's padded columns are zero) and are sliced off here.
    f_out_last = params[n_layers - 1][0].shape[1]
    return h[:num_nodes, :f_out_last]


def reference_forward(params, x, edge_index, edge_weights, n_activs):
    """Pure-JAX f32 reference of the same forward semantics."""
    num_nodes = x.shape[0]
    src = edge_index[0]
    dst = edge_index[1]
    loop = jnp.arange(num_nodes, dtype=edge_index.dtype)
    s = jnp.concatenate([src, loop])
    d = jnp.concatenate([dst, loop])
    w = jnp.concatenate(
        [edge_weights.astype(jnp.float32), jnp.ones((num_nodes,), jnp.float32)]
    )
    deg = jnp.zeros((num_nodes,), jnp.float32).at[d].add(w)
    dinv = jnp.where(deg > 0, jax.lax.rsqrt(deg), 0.0)
    norm = dinv[s] * w * dinv[d]
    a = jnp.zeros((num_nodes, num_nodes), jnp.float32).at[d, s].add(norm)
    h = x
    for i in range(min(len(params), n_activs)):
        W, b = params[i]
        h = a @ (h @ W) + b
        h = jnp.maximum(h, 0.0)
    return h


# ------------------------------- main ---------------------------------------

if __name__ == "__main__":
    key = jax.random.PRNGKey(0)

    # small synthetic graph (N=200 -> n_pad=256: tight 128-lane padding)
    num_nodes = 200
    num_edges = 800
    in_size = 16
    h_sizes = [32, 32]
    out_size = 8

    k_x, k_src, k_dst, k_w, k_p = jax.random.split(key, 5)
    x = jax.random.normal(k_x, (num_nodes, in_size), jnp.float32)
    src = jax.random.randint(k_src, (num_edges,), 0, num_nodes, jnp.int32)
    dst = jax.random.randint(k_dst, (num_edges,), 0, num_nodes, jnp.int32)
    edge_index = jnp.stack([src, dst], axis=0)            # [2, E]
    edge_weights = jax.random.uniform(k_w, (num_edges,), jnp.float32, 0.1, 1.0)

    params = init_params(k_p, in_size, out_size, h_sizes)
    n_activs = len(h_sizes)   # default activs = ['relu'] * len(h_sizes)

    # Fast path: VMEM-resident XW aggregation.
    out = basic_gcn_nc_forward(params, x, edge_index, edge_weights, n_activs,
                               dropout=0.5, training=False)
    out = jax.block_until_ready(out)
    assert out.shape == (num_nodes, h_sizes[-1]), out.shape
    assert bool(jnp.all(jnp.isfinite(out)))

    # Large-graph fallback path (tiled reduction, Buffered(3) A stream),
    # forced at small tiles to exercise the accumulator machinery.
    out_tiled = basic_gcn_nc_forward(params, x, edge_index, edge_weights,
                                     n_activs, preferred_tm=128,
                                     preferred_tk=128, force_tiled=True)
    out_tiled = jax.block_until_ready(out_tiled)
    assert bool(jnp.allclose(out, out_tiled, rtol=5e-2, atol=5e-2))

    # f32 reference (loose tolerance: A_hat / XW / activations use bf16).
    ref = reference_forward(params, x, edge_index, edge_weights, n_activs)
    err = float(jnp.max(jnp.abs(out - ref)))
    scale = float(jnp.max(jnp.abs(ref))) + 1.0
    assert err <= 5e-2 * scale, (err, scale)

    print("KERNEL_OK")
</pallas_src>

<mosaic_0001>
module attributes {stable_mosaic.version = 11 : i64} {
  func.func @xw_kernel(%arg0: i32, %arg1: memref<256x128xbf16, #tpu.memory_space<vmem>>, %arg2: memref<128x128xbf16, #tpu.memory_space<vmem>>, %arg3: memref<256x128xbf16, #tpu.memory_space<vmem>>) attributes {dimension_semantics = [#tpu.dimension_semantics<parallel>], iteration_bounds = array<i64: 1>, scalar_prefetch = 0 : i64, scratch_operands = 0 : i64, tpu.core_type = #tpu.core_type<tc>, window_params = [{transform_indices = @transform_0, window_bounds = array<i64: 256, 128>}, {pipeline_mode = #tpu.pipeline_mode<synchronous>, transform_indices = @transform_1, window_bounds = array<i64: 128, 128>}, {transform_indices = @transform_2, window_bounds = array<i64: 256, 128>}]} {
    %c0 = arith.constant 0 : index
    %c0_0 = arith.constant 0 : index
    %0 = vector.load %arg1[%c0, %c0_0] : memref<256x128xbf16, #tpu.memory_space<vmem>>, vector<256x128xbf16>
    %c0_1 = arith.constant 0 : index
    %c0_2 = arith.constant 0 : index
    %1 = vector.load %arg2[%c0_1, %c0_2] : memref<128x128xbf16, #tpu.memory_space<vmem>>, vector<128x128xbf16>
    %cst = arith.constant dense<0.000000e+00> : vector<256x128xf32>
    %2 = tpu.matmul %0, %1, %cst {dimension_numbers = #tpu.dot_dimension_numbers<[1], [0], [0], [1], [0, 0, 1, 1], [], []>} : vector<256x128xbf16>, vector<128x128xbf16>, vector<256x128xf32> -> vector<256x128xf32>
    %3 = arith.truncf %2 : vector<256x128xf32> to vector<256x128xbf16>
    %c0_3 = arith.constant 0 : index
    %c0_4 = arith.constant 0 : index
    %4 = vector.load %arg3[%c0_3, %c0_4] : memref<256x128xbf16, #tpu.memory_space<vmem>>, vector<256x128xbf16>
    tpu.vector_store %arg3[%c0_3, %c0_4], %3 {strides = array<i32>} : memref<256x128xbf16, #tpu.memory_space<vmem>>, vector<256x128xbf16>,
    return
  }
  func.func @transform_0(%arg0: i32) -> (i32, i32) {
    %c0_i32 = arith.constant 0 : i32
    %c0_i32_0 = arith.constant 0 : i32
    return %arg0, %c0_i32 : i32, i32
  }
  func.func @transform_1(%arg0: i32) -> (i32, i32) {
    %c0_i32 = arith.constant 0 : i32
    %c0_i32_0 = arith.constant 0 : i32
    %c0_i32_1 = arith.constant 0 : i32
    return %c0_i32, %c0_i32_0 : i32, i32
  }
  func.func @transform_2(%arg0: i32) -> (i32, i32) {
    %c0_i32 = arith.constant 0 : i32
    %c0_i32_0 = arith.constant 0 : i32
    return %arg0, %c0_i32 : i32, i32
  }
}

</mosaic_0001>

<bundles_post_ra>
// kernel: tpu_custom_call.1
= control target key start
LH: loop header
LB: loop body
LE: loop exit
PB: predicated region body
PF: predicated region fallthrough
CT: control target
= control target key end

     0   :  { %7 = vsyncpa [#allocation3], 0  ;;  %s769_s0 = inlined_call_operand.hbm [shape: bf16[256,128], index: 0, kind: input, shape index: {}]   ;;  %s770_s1 = inlined_call_operand.hbm [shape: bf16[128,128], index: 1, kind: input, shape index: {}]   ;;  %s771_s2 = inlined_call_operand.hbm [shape: bf16[256,128], index: 2, kind: output, shape index: {}]  }
   0x1   :  { %8 = vsyncpa [#allocation6], 0 }
   0x2   :  { %9 = vsyncpa [#allocation4], 0  ;;  %s14_s11 = sshll.u32 %s769_s0, 4  ;;  %s731_s12 = smov [#allocation2]   ;;  %s15_s11 = int_to_ptr.hbm [resolvable:$true] %s14_s11 }
   0x3   :  { %s16_s13 = sshll.u32 %s731_s12, 4  ;;  %s27_s16 = sshll.u32 %s770_s1, 4  ;;  %s17_s13 = int_to_ptr.vmem [resolvable:$true] %s16_s13  ;;  %s28_s16 = int_to_ptr.hbm [resolvable:$true] %s27_s16 }
   0x4   :  { %s732_s17 = smov 64   ;;  %s733_s18 = smov 4  }
   0x5   :  { %22 = dma.hbm_to_vmem [thread:$0]  %s15_s11, 2048, %s17_s13, [#allocation3], %s732_s17, %s732_s17, %s733_s18  }
   0x6   :  { %s734_s19 = smov [#allocation5]  }
   0x7   :  { %s29_s20 = sshll.u32 %s734_s19, 4  ;;  %s30_s20 = int_to_ptr.vmem [resolvable:$true] %s29_s20 }
   0x8   :  { %35 = dma.hbm_to_vmem [thread:$0]  %s28_s16, 1024, %s30_s20, [#allocation6], %s732_s17, %s732_s17, %s733_s18  }
   0x9   :  { %725 = dma.done.wait [#allocation3], 2048  }
   0xa   :  { %726 = vsyncadd [#allocation3], 4294965248 }
   0xb   :  { %727 = dma.done.wait [#allocation6], 1024  }
   0xc   :  { %728 = vsyncadd [#allocation6], 4294966272  ;;  %v528_v0 = vld [vmem:[#allocation5 + $0x38] sm:$0xff]  ;;  %v527_v1 = vld [vmem:[#allocation5 + $0x30] sm:$0xff]  ;;  %s735_s0 = smov [#allocation7]   ;;  %s395_s23 = sshll.u32 %s771_s2, 4  ;;  %s396_s23 = int_to_ptr.hbm [resolvable:$true] %s395_s23 }
   0xd   :  { %236 = vmatpush.bf16.msra.mxu0 %v528_v0  ;;  %624 = vmatpush.bf16.msra.mxu1 %v528_v0  ;;  %v526_v2 = vld [vmem:[#allocation5 + $0x28] sm:$0xff]  ;;  %v525_v3 = vld [vmem:[#allocation5 + $0x20] sm:$0xff]  ;;  %v524_v4 = vld [vmem:[#allocation5 + $0x18] sm:$0xff]  ;;  %s393_s1 = sshll.u32 %s735_s0, 4  ;;  %s394_s1 = int_to_ptr.vmem [resolvable:$true] %s393_s1 }
   0xe   :  { %625 = vmatpush.bf16.msra.mxu2 %v528_v0  ;;  %626 = vmatpush.bf16.msra.mxu3 %v528_v0  ;;  %v523_v5 = vld [vmem:[#allocation5 + $0x10] sm:$0xff]  ;;  %v522_v6 = vld [vmem:[#allocation5 + $0x8] sm:$0xff]  ;;  %v521_v7 = vld [vmem:[#allocation5] sm:$0xff] }
   0xf   :  { %v505_v8 = vld [vmem:[#allocation2] sm:$0xff]  ;;  %v506_v12 = vld [vmem:[#allocation2 + $0x8] sm:$0xff]  ;;  %v507_v16 = vld [vmem:[#allocation2 + $0x10] sm:$0xff] }
  0x10   :  { %v509_v9 = vld [vmem:[#allocation2 + $0x20] sm:$0xff]  ;;  %v510_v13 = vld [vmem:[#allocation2 + $0x28] sm:$0xff]  ;;  %v511_v17 = vld [vmem:[#allocation2 + $0x30] sm:$0xff] }
  0x11   :  { %237 = vmatpush.bf16.msra.mxu0 %v527_v1  ;;  %627 = vmatpush.bf16.msra.mxu1 %v527_v1  ;;  %v513_v10 = vld [vmem:[#allocation2 + $0x40] sm:$0xff]  ;;  %v514_v14 = vld [vmem:[#allocation2 + $0x48] sm:$0xff]  ;;  %v515_v18 = vld [vmem:[#allocation2 + $0x50] sm:$0xff] }
  0x12   :  { %628 = vmatpush.bf16.msra.mxu2 %v527_v1  ;;  %629 = vmatpush.bf16.msra.mxu3 %v527_v1  ;;  %v517_v11 = vld [vmem:[#allocation2 + $0x60] sm:$0xff]  ;;  %v518_v15 = vld [vmem:[#allocation2 + $0x68] sm:$0xff]  ;;  %v519_v19 = vld [vmem:[#allocation2 + $0x70] sm:$0xff] }
  0x13   :  { %v508_v20 = vld [vmem:[#allocation2 + $0x18] sm:$0xff] }
  0x14   :  { %v512_v21 = vld [vmem:[#allocation2 + $0x38] sm:$0xff] }
  0x15   :  { %238 = vmatpush.bf16.msra.mxu0 %v526_v2  ;;  %630 = vmatpush.bf16.msra.mxu1 %v526_v2  ;;  %v516_v22 = vld [vmem:[#allocation2 + $0x58] sm:$0xff] }
  0x16   :  { %631 = vmatpush.bf16.msra.mxu2 %v526_v2  ;;  %632 = vmatpush.bf16.msra.mxu3 %v526_v2  ;;  %v520_v23 = vld [vmem:[#allocation2 + $0x78] sm:$0xff] }
  0x19   :  { %239 = vmatpush.bf16.msra.mxu0 %v525_v3  ;;  %633 = vmatpush.bf16.msra.mxu1 %v525_v3 }
  0x1a   :  { %634 = vmatpush.bf16.msra.mxu2 %v525_v3  ;;  %635 = vmatpush.bf16.msra.mxu3 %v525_v3 }
  0x1d   :  { %240 = vmatpush.bf16.msra.mxu0 %v524_v4  ;;  %636 = vmatpush.bf16.msra.mxu1 %v524_v4 }
  0x1e   :  { %637 = vmatpush.bf16.msra.mxu2 %v524_v4  ;;  %638 = vmatpush.bf16.msra.mxu3 %v524_v4 }
  0x21   :  { %241 = vmatpush.bf16.msra.mxu0 %v523_v5  ;;  %639 = vmatpush.bf16.msra.mxu1 %v523_v5 }
  0x22   :  { %640 = vmatpush.bf16.msra.mxu2 %v523_v5  ;;  %641 = vmatpush.bf16.msra.mxu3 %v523_v5 }
  0x25   :  { %242 = vmatpush.bf16.msra.mxu0 %v522_v6  ;;  %642 = vmatpush.bf16.msra.mxu1 %v522_v6 }
  0x26   :  { %643 = vmatpush.bf16.msra.mxu2 %v522_v6  ;;  %644 = vmatpush.bf16.msra.mxu3 %v522_v6 }
  0x29   :  { %243 = vmatpush.bf16.msra.mxu0 %v521_v7  ;;  %645 = vmatpush.bf16.msra.mxu1 %v521_v7 }
  0x2a   :  { %646 = vmatpush.bf16.msra.mxu2 %v521_v7  ;;  %647 = vmatpush.bf16.msra.mxu3 %v521_v7 }
  0x2c   :  { %244 = vmatmul.bf16.vlgmr.msra.gmra.mxu0 %v505_v8  ;;  %264 = vmatmul.bf16.vlgmr.msra.gmra.mxu1 %v509_v9 }
  0x2d   :  { %284 = vmatmul.bf16.vlgmr.msra.gmra.mxu2 %v513_v10  ;;  %304 = vmatmul.bf16.vlgmr.msra.gmra.mxu3 %v517_v11 }
  0x3c   :  { %249 = vmatmul.bf16.gmra.mxu0 %v506_v12  ;;  %269 = vmatmul.bf16.gmra.mxu1 %v510_v13 }
  0x3d   :  { %289 = vmatmul.bf16.gmra.mxu2 %v514_v14  ;;  %309 = vmatmul.bf16.gmra.mxu3 %v518_v15 }
  0x4c   :  { %254 = vmatmul.bf16.gmra.mxu0 %v507_v16  ;;  %274 = vmatmul.bf16.gmra.mxu1 %v511_v17 }
  0x4d   :  { %294 = vmatmul.bf16.gmra.mxu2 %v515_v18  ;;  %314 = vmatmul.bf16.gmra.mxu3 %v519_v19 }
  0x5c   :  { %259 = vmatmul.bf16.gmra.mxu0 %v508_v20  ;;  %279 = vmatmul.bf16.gmra.mxu1 %v512_v21 }
  0x5d   :  { %299 = vmatmul.bf16.gmra.mxu2 %v516_v22  ;;  %319 = vmatmul.bf16.gmra.mxu3 %v520_v23 }
  0xa9   :  { %v245_v24 = vpop.f32.mrf.mxu0  ;;  %v265_v25 = vpop.f32.mrf.mxu1 }
  0xb0   :  { %v285_v26 = vpop.f32.mrf.mxu2  ;;  %v305_v27 = vpop.f32.mrf.mxu3 }
  0xb1   :  { %v247_v28 = vpop.f32.mrf.mxu0  ;;  %v267_v29 = vpop.f32.mrf.mxu1 }
  0xb2   :  { %v532_v30 = vpack.c.bf16 %v247_v28, %v245_v24  ;;  %v552_v31 = vpack.c.bf16 %v267_v29, %v265_v25 }
  0xb4   :  { %533 = vst [vmem:[#allocation7] sm:$0xff] %v532_v30  }
  0xb5   :  { %612 = vst [vmem:[#allocation7 + $0x20] sm:$0xff] %v552_v31  }
  0xb8   :  { %v287_v32 = vpop.f32.mrf.mxu2  ;;  %v307_v33 = vpop.f32.mrf.mxu3 }
  0xb9   :  { %v572_v34 = vpack.c.bf16 %v287_v32, %v285_v26  ;;  %v592_v35 = vpack.c.bf16 %v307_v33, %v305_v27  ;;  %v250_v36 = vpop.f32.mrf.mxu0  ;;  %v270_v37 = vpop.f32.mrf.mxu1 }
  0xbb   :  { %616 = vst [vmem:[#allocation7 + $0x40] sm:$0xff] %v572_v34  }
  0xbc   :  { %620 = vst [vmem:[#allocation7 + $0x60] sm:$0xff] %v592_v35  }
  0xc0   :  { %v290_v38 = vpop.f32.mrf.mxu2  ;;  %v310_v39 = vpop.f32.mrf.mxu3 }
  0xc1   :  { %v252_v40 = vpop.f32.mrf.mxu0  ;;  %v272_v41 = vpop.f32.mrf.mxu1 }
  0xc2   :  { %v537_v42 = vpack.c.bf16 %v252_v40, %v250_v36  ;;  %v557_v43 = vpack.c.bf16 %v272_v41, %v270_v37 }
  0xc4   :  { %609 = vst [vmem:[#allocation7 + $0x8] sm:$0xff] %v537_v42  }
  0xc5   :  { %613 = vst [vmem:[#allocation7 + $0x28] sm:$0xff] %v557_v43  }
  0xc8   :  { %v292_v44 = vpop.f32.mrf.mxu2  ;;  %v312_v45 = vpop.f32.mrf.mxu3 }
  0xc9   :  { %v577_v46 = vpack.c.bf16 %v292_v44, %v290_v38  ;;  %v597_v47 = vpack.c.bf16 %v312_v45, %v310_v39  ;;  %v255_v48 = vpop.f32.mrf.mxu0  ;;  %v275_v49 = vpop.f32.mrf.mxu1 }
  0xcb   :  { %617 = vst [vmem:[#allocation7 + $0x48] sm:$0xff] %v577_v46  }
  0xcc   :  { %621 = vst [vmem:[#allocation7 + $0x68] sm:$0xff] %v597_v47  }
  0xd0   :  { %v295_v50 = vpop.f32.mrf.mxu2  ;;  %v315_v51 = vpop.f32.mrf.mxu3 }
  0xd1   :  { %v257_v52 = vpop.f32.mrf.mxu0  ;;  %v277_v53 = vpop.f32.mrf.mxu1 }
  0xd2   :  { %v542_v54 = vpack.c.bf16 %v257_v52, %v255_v48  ;;  %v562_v55 = vpack.c.bf16 %v277_v53, %v275_v49 }
  0xd4   :  { %610 = vst [vmem:[#allocation7 + $0x10] sm:$0xff] %v542_v54  }
  0xd5   :  { %614 = vst [vmem:[#allocation7 + $0x30] sm:$0xff] %v562_v55  }
  0xd8   :  { %v297_v56 = vpop.f32.mrf.mxu2  ;;  %v317_v57 = vpop.f32.mrf.mxu3 }
  0xd9   :  { %v582_v58 = vpack.c.bf16 %v297_v56, %v295_v50  ;;  %v602_v59 = vpack.c.bf16 %v317_v57, %v315_v51  ;;  %v260_v60 = vpop.f32.mrf.mxu0  ;;  %v280_v61 = vpop.f32.mrf.mxu1 }
  0xdb   :  { %618 = vst [vmem:[#allocation7 + $0x50] sm:$0xff] %v582_v58  }
  0xdc   :  { %622 = vst [vmem:[#allocation7 + $0x70] sm:$0xff] %v602_v59  }
  0xe0   :  { %v300_v62 = vpop.f32.mrf.mxu2  ;;  %v320_v63 = vpop.f32.mrf.mxu3 }
  0xe1   :  { %v262_v0 = vpop.f32.mrf.mxu0  ;;  %v282_v1 = vpop.f32.mrf.mxu1 }
  0xe2   :  { %v547_v2 = vpack.c.bf16 %v262_v0, %v260_v60  ;;  %v567_v3 = vpack.c.bf16 %v282_v1, %v280_v61 }
  0xe4   :  { %611 = vst [vmem:[#allocation7 + $0x18] sm:$0xff] %v547_v2  }
  0xe5   :  { %615 = vst [vmem:[#allocation7 + $0x38] sm:$0xff] %v567_v3  }
  0xe8   :  { %v302_v4 = vpop.f32.mrf.mxu2  ;;  %v322_v5 = vpop.f32.mrf.mxu3 }
  0xe9   :  { %v587_v6 = vpack.c.bf16 %v302_v4, %v300_v62  ;;  %v607_v7 = vpack.c.bf16 %v322_v5, %v320_v63 }
  0xeb   :  { %619 = vst [vmem:[#allocation7 + $0x58] sm:$0xff] %v587_v6  }
  0xec   :  { %623 = vst [vmem:[#allocation7 + $0x78] sm:$0xff] %v607_v7  }
  0xed   :  { %401 = dma.vmem_to_hbm [thread:$0]  %s394_s1, 2048, %s396_s23, [#allocation4], %s732_s17, %s732_s17, %s733_s18  }
  0xee   :  { %729 = dma.done.wait [#allocation4], 2048  }
  0xef   :  { %730 = vsyncadd [#allocation4], 4294965248 }
  0xf0   :  { %406 = vsyncpa [#allocation3], 1 }
  0xf1   :  { %407 = vsyncpa [#allocation6], 1 }
  0xf2   :  { %408 = vsyncpa [#allocation4], 1 }

</bundles_post_ra>
